<compile_context>
chip_gen: v5e
topology: v5e:2x2
jax: 0.10.0
libtpu: 0.0.40
codegen_flags: <defaults>
</compile_context>

<pallas_src>
import jax
import jax.numpy as jnp
import numpy as np
from jax.experimental import pallas as pl
from jax.experimental.pallas import tpu as pltpu


def decoder_step_kernel(ids_ref, gate_tbl_ref, b_gates_ref, b_hn_ref,
                        w_out_ref, b_out_ref, out_ref):
    """One decoder step per grid point t (h_prev == 0 by construction).

    ids_ref      : (T, B) int32 token ids, SMEM (scalar prefetch)
    gate_tbl_ref : (V, 3G) f32  = relu(embedding) @ W_ih^T, gate g at lanes [g*G, g*G+L)
    b_gates_ref  : (1, 3G) f32  = [b_ir+b_hr | b_iz+b_hz | b_in], zero-padded per gate block
    b_hn_ref     : (1, G)  f32  = b_hn, zero-padded
    w_out_ref    : (G, W)  f32  rows [0,L): [I_L | W_lin^T | 0]; rows [L,G): 0
    b_out_ref    : (1, W)  f32  = [0 | b_lin | 0]
    out_ref      : (B, W)  f32  output slab: lanes [0,L) = h_new, lanes [L,L+V) = logits
    """
    t = pl.program_id(0)
    B = out_ref.shape[0]
    V = gate_tbl_ref.shape[0]
    G = b_hn_ref.shape[1]

    # Token ids for this step: scalar SMEM reads splatted into a (B, 1) vector
    # (B is small & static -> unrolled vector selects, no VMEM DMA for the ids).
    row = jax.lax.broadcasted_iota(jnp.int32, (B, 1), 0)
    ids = jnp.zeros((B, 1), jnp.int32)
    for b in range(B):
        ids = jnp.where(row == b, ids_ref[t, b], ids)

    # One-hot gather-matmul against the precomputed gate table (relu(emb) @ W_ih^T folded in).
    col = jax.lax.broadcasted_iota(jnp.int32, (B, V), 1)
    onehot = (col == ids).astype(jnp.float32)                                       # (B, V)
    gates = jnp.dot(onehot, gate_tbl_ref[...],
                    preferred_element_type=jnp.float32) + b_gates_ref[...]          # (B, 3G)

    # Lane-tile aligned gate slices (G is a multiple of 128).
    r = jax.nn.sigmoid(gates[:, 0 * G:1 * G])
    z = jax.nn.sigmoid(gates[:, 1 * G:2 * G])
    n = jnp.tanh(gates[:, 2 * G:3 * G] + r * b_hn_ref[...])
    h_new = (1.0 - z) * n     # + z*h_prev dropped: h_prev == 0; pad lanes are exactly 0

    # Single lane-dense output slab: h_new @ [I_L | W_lin | 0] + [0 | b_lin | 0].
    out_ref[...] = (jnp.dot(h_new, w_out_ref[...],
                            preferred_element_type=jnp.float32) + b_out_ref[...])


def init_decoder_params(key, out_size, latent_size, emb_size):
    """Returns (raw PyTorch-shaped params, fused kernel params)."""
    ks = jax.random.split(key, 7)
    u = lambda k, shape: jax.random.uniform(k, shape, jnp.float32, -0.1, 0.1)
    L, V, E = latent_size, out_size, emb_size

    raw = {
        "embedding": u(ks[0], (V, E)),          # nn.Embedding(out_size, emb_size)
        "w_ih": u(ks[1], (3 * L, E)),           # GRU weight_ih_l0 (row blocks: r, z, n)
        "w_hh": u(ks[2], (3 * L, L)),           # GRU weight_hh_l0 (unused: h0 == 0)
        "b_ih": u(ks[3], (3 * L,)),
        "b_hh": u(ks[4], (3 * L,)),
        "w_lin": u(ks[5], (V, L)),              # nn.Linear(latent_size, out_size)
        "b_lin": u(ks[6], (V,)),
    }

    G = max(128, ((L + 127) // 128) * 128)          # lane-tile padded per-gate width
    W = max(128, ((L + V + 127) // 128) * 128)      # lane-dense output slab width

    # Fold embedding gather + ReLU into the gate weights (exact: one-hot selects one row).
    relu_emb = jnp.maximum(raw["embedding"], 0.0)                   # (V, E)
    gate_tbl_raw = relu_emb @ raw["w_ih"].T                         # (V, 3L), col blocks [r|z|n]

    pad_cols = lambda m, w: jnp.pad(m, ((0, 0), (0, w - m.shape[1])))
    gate_tbl = jnp.concatenate(
        [pad_cols(gate_tbl_raw[:, g * L:(g + 1) * L], G) for g in range(3)], axis=1)  # (V, 3G)

    b_ih, b_hh = raw["b_ih"], raw["b_hh"]
    padvec = lambda v: jnp.pad(v, (0, G - L))
    b_gates = jnp.concatenate([padvec(b_ih[0:L] + b_hh[0:L]),           # r: b_ir + b_hr
                               padvec(b_ih[L:2 * L] + b_hh[L:2 * L]),   # z: b_iz + b_hz
                               padvec(b_ih[2 * L:3 * L])])[None, :]     # n: b_in
    b_hn = padvec(b_hh[2 * L:3 * L])[None, :]                           # (1, G)

    w_out = jnp.zeros((G, W), jnp.float32)
    w_out = w_out.at[:L, :L].set(jnp.eye(L, dtype=jnp.float32))
    w_out = w_out.at[:L, L:L + V].set(raw["w_lin"].T)                   # (G, W)
    b_out = jnp.zeros((W,), jnp.float32).at[L:L + V].set(raw["b_lin"])[None, :]

    fused = {
        "gate_tbl": gate_tbl, "b_gates": b_gates, "b_hn": b_hn,
        "w_out": w_out, "b_out": b_out,
        "latent_size": L, "out_size": V, "gate_width": G,
    }
    return raw, fused


def decoder_forward_steps(fused, tokens):
    """Runs T independent decoder steps (each with h0 == 0, exactly like Decoder.forward,
    which ignores its `h` argument) inside ONE pallas_call; weights are DMAed into VMEM once
    and stay resident across the whole time grid."""
    tokens = jnp.asarray(tokens, jnp.int32)
    if tokens.ndim == 1:
        tokens = tokens[None, :]
    T, B = tokens.shape
    L, V = fused["latent_size"], fused["out_size"]
    G = fused["gate_width"]
    W = fused["w_out"].shape[1]
    if T > 1 and B % 8 != 0:
        raise ValueError("multi-step grid expects batch to be a multiple of 8 (sublane tile)")

    const = lambda t, ids: (0, 0)         # same block every step -> weights stay VMEM-resident
    grid_spec = pltpu.PrefetchScalarGridSpec(
        num_scalar_prefetch=1,            # token ids land in SMEM before the grid runs
        grid=(T,),
        in_specs=[
            pl.BlockSpec((V, 3 * G), const),      # gate_tbl
            pl.BlockSpec((1, 3 * G), const),      # b_gates
            pl.BlockSpec((1, G), const),          # b_hn
            pl.BlockSpec((G, W), const),          # w_out
            pl.BlockSpec((1, W), const),          # b_out
        ],
        out_specs=pl.BlockSpec((B, W), lambda t, ids: (t, 0)),
    )

    weight_bytes = 4 * sum(int(np.prod(fused[k].shape))
                           for k in ("gate_tbl", "b_gates", "b_hn", "w_out", "b_out"))
    cost = pl.CostEstimate(
        flops=int(T * (2 * B * V * 3 * G + 2 * B * G * W + 12 * B * G)),
        transcendentals=int(T * 3 * B * G),
        bytes_accessed=int(weight_bytes + tokens.size * 4 + T * B * W * 4),
    )

    out_slab = pl.pallas_call(
        decoder_step_kernel,
        out_shape=jax.ShapeDtypeStruct((T * B, W), jnp.float32),
        grid_spec=grid_spec,
        compiler_params=pltpu.CompilerParams(dimension_semantics=("arbitrary",)),
        cost_estimate=cost,
    )(tokens, fused["gate_tbl"], fused["b_gates"], fused["b_hn"],
      fused["w_out"], fused["b_out"])

    out_slab = out_slab.reshape(T, B, W)
    return out_slab[:, :, L:L + V], out_slab[:, :, :L]      # (T,B,V) logits, (T,B,L) h


def decoder_forward(fused, x_tokens, h_unused):
    """Mirrors Decoder.forward(x, h): x.view(1, -1) -> one step; `h` is ignored (h0 == 0)."""
    x_flat = jnp.asarray(x_tokens).reshape(-1).astype(jnp.int32)
    logits, h_new = decoder_forward_steps(fused, x_flat[None, :])
    # PyTorch returns (linear(h).squeeze(), h) with h of shape (1, B, L).
    return jnp.squeeze(logits[0]), h_new


def decoder_forward_ref(raw, x_tokens, h_unused):
    """Pure-JAX reference with the FULL (un-fused) GRU math and h0 = zeros, for validation."""
    x_tokens = jnp.asarray(x_tokens).reshape(-1)
    B = x_tokens.shape[0]
    L = raw["w_hh"].shape[1]
    x = jnp.maximum(raw["embedding"][x_tokens], 0.0)
    h_prev = jnp.zeros((B, L), jnp.float32)
    gi = x @ raw["w_ih"].T + raw["b_ih"]
    gh = h_prev @ raw["w_hh"].T + raw["b_hh"]
    r = jax.nn.sigmoid(gi[:, :L] + gh[:, :L])
    z = jax.nn.sigmoid(gi[:, L:2 * L] + gh[:, L:2 * L])
    n = jnp.tanh(gi[:, 2 * L:] + r * gh[:, 2 * L:])
    h_new = (1.0 - z) * n + z * h_prev
    logits = h_new @ raw["w_lin"].T + raw["b_lin"]
    return jnp.squeeze(logits), h_new[None, :, :]


if __name__ == "__main__":
    # Module-consistent small shapes: vocab (out_size)=16, emb=32, latent=64,
    # batch=8 (full sublane tile), 12 independent decode steps.
    out_size, latent_size, emb_size = 16, 64, 32
    batch, steps = 8, 12

    key = jax.random.PRNGKey(0)
    kp, kx, kh = jax.random.split(key, 3)
    raw, fused = init_decoder_params(kp, out_size, latent_size, emb_size)

    tokens = jax.random.randint(kx, (steps, batch), 0, out_size, dtype=jnp.int32)
    h_in = jax.random.normal(kh, (1, batch, latent_size), jnp.float32)   # ignored by forward()

    # Single-step call, exactly mirroring Decoder.forward(x, h).
    logits, h_out = decoder_forward(fused, tokens[0], h_in)
    jax.block_until_ready((logits, h_out))
    logits_ref, h_ref = decoder_forward_ref(raw, tokens[0], h_in)
    assert logits.shape == (batch, out_size) and h_out.shape == (1, batch, latent_size)
    np.testing.assert_allclose(np.asarray(logits), np.asarray(logits_ref), rtol=1e-5, atol=1e-5)
    np.testing.assert_allclose(np.asarray(h_out), np.asarray(h_ref), rtol=1e-5, atol=1e-5)

    # Amortized multi-step call: all `steps` decoder invocations in ONE pallas_call
    # (weights DMAed to VMEM once; one (8,128) lane-dense store per grid step).
    logits_all, h_all = decoder_forward_steps(fused, tokens)
    jax.block_until_ready((logits_all, h_all))
    for t in range(steps):
        lr, hr = decoder_forward_ref(raw, tokens[t], h_in)
        np.testing.assert_allclose(np.asarray(logits_all[t]), np.asarray(lr), rtol=1e-5, atol=1e-5)
        np.testing.assert_allclose(np.asarray(h_all[t]), np.asarray(hr[0]), rtol=1e-5, atol=1e-5)

    print("KERNEL_OK")
</pallas_src>

<mosaic_0001>
module attributes {stable_mosaic.version = 11 : i64} {
  func.func @decoder_step_kernel(%arg0: i32, %arg1: memref<1x8xi32, #tpu.memory_space<smem>>, %arg2: memref<16x384xf32, #tpu.memory_space<vmem>>, %arg3: memref<1x384xf32, #tpu.memory_space<vmem>>, %arg4: memref<1x128xf32, #tpu.memory_space<vmem>>, %arg5: memref<128x128xf32, #tpu.memory_space<vmem>>, %arg6: memref<1x128xf32, #tpu.memory_space<vmem>>, %arg7: memref<8x128xf32, #tpu.memory_space<vmem>>) attributes {dimension_semantics = [#tpu.dimension_semantics<arbitrary>], iteration_bounds = array<i64: 1>, scalar_prefetch = 1 : i64, scratch_operands = 0 : i64, tpu.core_type = #tpu.core_type<tc>, window_params = [{pipeline_mode = #tpu.pipeline_mode<synchronous>, transform_indices = @transform_0, window_bounds = array<i64: 16, 384>}, {pipeline_mode = #tpu.pipeline_mode<synchronous>, transform_indices = @transform_1, window_bounds = array<i64: 1, 384>}, {pipeline_mode = #tpu.pipeline_mode<synchronous>, transform_indices = @transform_2, window_bounds = array<i64: 1, 128>}, {pipeline_mode = #tpu.pipeline_mode<synchronous>, transform_indices = @transform_3, window_bounds = array<i64: 128, 128>}, {pipeline_mode = #tpu.pipeline_mode<synchronous>, transform_indices = @transform_4, window_bounds = array<i64: 1, 128>}, {transform_indices = @transform_5, window_bounds = array<i64: 8, 128>}]} {
    %0 = tpu.iota {dimensions = array<i32: 0>} : vector<8x1xi32>
    %c0_i32 = arith.constant 0 : i32
    %1 = vector.broadcast %c0_i32 : i32 to vector<8x1xi32>
    %c0_i32_0 = arith.constant 0 : i32
    %2 = vector.broadcast %c0_i32_0 : i32 to vector<8x1xi32>
    %3 = arith.cmpi eq, %0, %2 : vector<8x1xi32>
    %4 = arith.index_cast %arg0 : i32 to index
    %c0 = arith.constant 0 : index
    %5 = memref.load %arg1[%4, %c0] : memref<1x8xi32, #tpu.memory_space<smem>>
    %6 = vector.broadcast %5 : i32 to vector<8x1xi32>
    %7 = arith.select %3, %6, %1 : vector<8x1xi1>, vector<8x1xi32>
    %c1_i32 = arith.constant 1 : i32
    %8 = vector.broadcast %c1_i32 : i32 to vector<8x1xi32>
    %9 = arith.cmpi eq, %0, %8 : vector<8x1xi32>
    %10 = arith.index_cast %arg0 : i32 to index
    %c1 = arith.constant 1 : index
    %11 = memref.load %arg1[%10, %c1] : memref<1x8xi32, #tpu.memory_space<smem>>
    %12 = vector.broadcast %11 : i32 to vector<8x1xi32>
    %13 = arith.select %9, %12, %7 : vector<8x1xi1>, vector<8x1xi32>
    %c2_i32 = arith.constant 2 : i32
    %14 = vector.broadcast %c2_i32 : i32 to vector<8x1xi32>
    %15 = arith.cmpi eq, %0, %14 : vector<8x1xi32>
    %16 = arith.index_cast %arg0 : i32 to index
    %c2 = arith.constant 2 : index
    %17 = memref.load %arg1[%16, %c2] : memref<1x8xi32, #tpu.memory_space<smem>>
    %18 = vector.broadcast %17 : i32 to vector<8x1xi32>
    %19 = arith.select %15, %18, %13 : vector<8x1xi1>, vector<8x1xi32>
    %c3_i32 = arith.constant 3 : i32
    %20 = vector.broadcast %c3_i32 : i32 to vector<8x1xi32>
    %21 = arith.cmpi eq, %0, %20 : vector<8x1xi32>
    %22 = arith.index_cast %arg0 : i32 to index
    %c3 = arith.constant 3 : index
    %23 = memref.load %arg1[%22, %c3] : memref<1x8xi32, #tpu.memory_space<smem>>
    %24 = vector.broadcast %23 : i32 to vector<8x1xi32>
    %25 = arith.select %21, %24, %19 : vector<8x1xi1>, vector<8x1xi32>
    %c4_i32 = arith.constant 4 : i32
    %26 = vector.broadcast %c4_i32 : i32 to vector<8x1xi32>
    %27 = arith.cmpi eq, %0, %26 : vector<8x1xi32>
    %28 = arith.index_cast %arg0 : i32 to index
    %c4 = arith.constant 4 : index
    %29 = memref.load %arg1[%28, %c4] : memref<1x8xi32, #tpu.memory_space<smem>>
    %30 = vector.broadcast %29 : i32 to vector<8x1xi32>
    %31 = arith.select %27, %30, %25 : vector<8x1xi1>, vector<8x1xi32>
    %c5_i32 = arith.constant 5 : i32
    %32 = vector.broadcast %c5_i32 : i32 to vector<8x1xi32>
    %33 = arith.cmpi eq, %0, %32 : vector<8x1xi32>
    %34 = arith.index_cast %arg0 : i32 to index
    %c5 = arith.constant 5 : index
    %35 = memref.load %arg1[%34, %c5] : memref<1x8xi32, #tpu.memory_space<smem>>
    %36 = vector.broadcast %35 : i32 to vector<8x1xi32>
    %37 = arith.select %33, %36, %31 : vector<8x1xi1>, vector<8x1xi32>
    %c6_i32 = arith.constant 6 : i32
    %38 = vector.broadcast %c6_i32 : i32 to vector<8x1xi32>
    %39 = arith.cmpi eq, %0, %38 : vector<8x1xi32>
    %40 = arith.index_cast %arg0 : i32 to index
    %c6 = arith.constant 6 : index
    %41 = memref.load %arg1[%40, %c6] : memref<1x8xi32, #tpu.memory_space<smem>>
    %42 = vector.broadcast %41 : i32 to vector<8x1xi32>
    %43 = arith.select %39, %42, %37 : vector<8x1xi1>, vector<8x1xi32>
    %c7_i32 = arith.constant 7 : i32
    %44 = vector.broadcast %c7_i32 : i32 to vector<8x1xi32>
    %45 = arith.cmpi eq, %0, %44 : vector<8x1xi32>
    %46 = arith.index_cast %arg0 : i32 to index
    %c7 = arith.constant 7 : index
    %47 = memref.load %arg1[%46, %c7] : memref<1x8xi32, #tpu.memory_space<smem>>
    %48 = vector.broadcast %47 : i32 to vector<8x1xi32>
    %49 = arith.select %45, %48, %43 : vector<8x1xi1>, vector<8x1xi32>
    %50 = tpu.iota {dimensions = array<i32: 1>} : vector<8x16xi32>
    %51 = vector.broadcast %49 : vector<8x1xi32> to vector<8x16xi32>
    %52 = arith.cmpi eq, %50, %51 : vector<8x16xi32>
    %53 = arith.extui %52 : vector<8x16xi1> to vector<8x16xi32>
    %54 = arith.sitofp %53 : vector<8x16xi32> to vector<8x16xf32>
    %c0_1 = arith.constant 0 : index
    %c0_2 = arith.constant 0 : index
    %55 = vector.load %arg2[%c0_1, %c0_2] : memref<16x384xf32, #tpu.memory_space<vmem>>, vector<16x384xf32>
    %cst = arith.constant dense<0.000000e+00> : vector<8x384xf32>
    %56 = tpu.matmul %54, %55, %cst {dimension_numbers = #tpu.dot_dimension_numbers<[1], [0], [0], [1], [0, 0, 1, 1], [], []>} : vector<8x16xf32>, vector<16x384xf32>, vector<8x384xf32> -> vector<8x384xf32>
    %c0_3 = arith.constant 0 : index
    %c0_4 = arith.constant 0 : index
    %57 = vector.load %arg3[%c0_3, %c0_4] : memref<1x384xf32, #tpu.memory_space<vmem>>, vector<1x384xf32>
    %58 = vector.broadcast %57 : vector<1x384xf32> to vector<8x384xf32>
    %59 = arith.addf %56, %58 : vector<8x384xf32>
    %60 = vector.extract_strided_slice %59 {offsets = [0, 0], sizes = [8, 128], strides = [1, 1]} : vector<8x384xf32> to vector<8x128xf32>
    %61 = arith.negf %60 : vector<8x128xf32>
    %62 = math.exp %61 : vector<8x128xf32>
    %cst_5 = arith.constant 1.000000e+00 : f32
    %63 = vector.broadcast %cst_5 : f32 to vector<8x128xf32>
    %64 = arith.addf %63, %62 : vector<8x128xf32>
    %65 = arith.divf %63, %64 : vector<8x128xf32>
    %66 = vector.extract_strided_slice %59 {offsets = [0, 128], sizes = [8, 128], strides = [1, 1]} : vector<8x384xf32> to vector<8x128xf32>
    %67 = arith.negf %66 : vector<8x128xf32>
    %68 = math.exp %67 : vector<8x128xf32>
    %cst_6 = arith.constant 1.000000e+00 : f32
    %69 = vector.broadcast %cst_6 : f32 to vector<8x128xf32>
    %70 = arith.addf %69, %68 : vector<8x128xf32>
    %71 = arith.divf %69, %70 : vector<8x128xf32>
    %72 = vector.extract_strided_slice %59 {offsets = [0, 256], sizes = [8, 128], strides = [1, 1]} : vector<8x384xf32> to vector<8x128xf32>
    %c0_7 = arith.constant 0 : index
    %c0_8 = arith.constant 0 : index
    %73 = vector.load %arg4[%c0_7, %c0_8] : memref<1x128xf32, #tpu.memory_space<vmem>>, vector<1x128xf32>
    %74 = vector.broadcast %73 : vector<1x128xf32> to vector<8x128xf32>
    %75 = arith.mulf %65, %74 : vector<8x128xf32>
    %76 = arith.addf %72, %75 : vector<8x128xf32>
    %77 = math.tanh %76 : vector<8x128xf32>
    %cst_9 = arith.constant 1.000000e+00 : f32
    %78 = vector.broadcast %cst_9 : f32 to vector<8x128xf32>
    %79 = arith.subf %78, %71 : vector<8x128xf32>
    %80 = arith.mulf %79, %77 : vector<8x128xf32>
    %c0_10 = arith.constant 0 : index
    %c0_11 = arith.constant 0 : index
    %81 = vector.load %arg5[%c0_10, %c0_11] : memref<128x128xf32, #tpu.memory_space<vmem>>, vector<128x128xf32>
    %cst_12 = arith.constant dense<0.000000e+00> : vector<8x128xf32>
    %82 = tpu.matmul %80, %81, %cst_12 {dimension_numbers = #tpu.dot_dimension_numbers<[1], [0], [0], [1], [0, 0, 1, 1], [], []>} : vector<8x128xf32>, vector<128x128xf32>, vector<8x128xf32> -> vector<8x128xf32>
    %c0_13 = arith.constant 0 : index
    %c0_14 = arith.constant 0 : index
    %83 = vector.load %arg6[%c0_13, %c0_14] : memref<1x128xf32, #tpu.memory_space<vmem>>, vector<1x128xf32>
    %84 = vector.broadcast %83 : vector<1x128xf32> to vector<8x128xf32>
    %85 = arith.addf %82, %84 : vector<8x128xf32>
    %c0_15 = arith.constant 0 : index
    %c0_16 = arith.constant 0 : index
    %86 = vector.load %arg7[%c0_15, %c0_16] : memref<8x128xf32, #tpu.memory_space<vmem>>, vector<8x128xf32>
    tpu.vector_store %arg7[%c0_15, %c0_16], %85 {strides = array<i32>} : memref<8x128xf32, #tpu.memory_space<vmem>>, vector<8x128xf32>,
    return
  }
  func.func @transform_0(%arg0: i32, %arg1: memref<1x8xi32, #tpu.memory_space<smem>>) -> (i32, i32) {
    %c0_i32 = arith.constant 0 : i32
    %c0_i32_0 = arith.constant 0 : i32
    %c0_i32_1 = arith.constant 0 : i32
    return %c0_i32, %c0_i32_0 : i32, i32
  }
  func.func @transform_1(%arg0: i32, %arg1: memref<1x8xi32, #tpu.memory_space<smem>>) -> (i32, i32) {
    %c0_i32 = arith.constant 0 : i32
    %c0_i32_0 = arith.constant 0 : i32
    %c0_i32_1 = arith.constant 0 : i32
    return %c0_i32, %c0_i32_0 : i32, i32
  }
  func.func @transform_2(%arg0: i32, %arg1: memref<1x8xi32, #tpu.memory_space<smem>>) -> (i32, i32) {
    %c0_i32 = arith.constant 0 : i32
    %c0_i32_0 = arith.constant 0 : i32
    %c0_i32_1 = arith.constant 0 : i32
    return %c0_i32, %c0_i32_0 : i32, i32
  }
  func.func @transform_3(%arg0: i32, %arg1: memref<1x8xi32, #tpu.memory_space<smem>>) -> (i32, i32) {
    %c0_i32 = arith.constant 0 : i32
    %c0_i32_0 = arith.constant 0 : i32
    %c0_i32_1 = arith.constant 0 : i32
    return %c0_i32, %c0_i32_0 : i32, i32
  }
  func.func @transform_4(%arg0: i32, %arg1: memref<1x8xi32, #tpu.memory_space<smem>>) -> (i32, i32) {
    %c0_i32 = arith.constant 0 : i32
    %c0_i32_0 = arith.constant 0 : i32
    %c0_i32_1 = arith.constant 0 : i32
    return %c0_i32, %c0_i32_0 : i32, i32
  }
  func.func @transform_5(%arg0: i32, %arg1: memref<1x8xi32, #tpu.memory_space<smem>>) -> (i32, i32) {
    %c0_i32 = arith.constant 0 : i32
    %c0_i32_0 = arith.constant 0 : i32
    return %arg0, %c0_i32 : i32, i32
  }
}

</mosaic_0001>

<bundles_post_ra>
// kernel: tpu_custom_call.1
= control target key start
LH: loop header
LB: loop body
LE: loop exit
PB: predicated region body
PF: predicated region fallthrough
CT: control target
= control target key end

     0   :  { %s457_s24 = smov [#allocation3]   ;;  %s532_s0 = inlined_call_operand.hbm [shape: s32[1,8], index: 0, kind: input, shape index: {}]   ;;  %s533_s1 = inlined_call_operand.hbm [shape: f32[16,384], index: 1, kind: input, shape index: {}]   ;;  %s534_s2 = inlined_call_operand.hbm [shape: f32[1,384], index: 2, kind: input, shape index: {}]   ;;  %s535_s3 = inlined_call_operand.vmem [shape: f32[1,128], index: 3, kind: input, shape index: {}]   ;;  %s536_s4 = inlined_call_operand.hbm [shape: f32[128,128], index: 4, kind: input, shape index: {}]   ;;  %s537_s5 = inlined_call_operand.vmem [shape: f32[1,128], index: 5, kind: input, shape index: {}]   ;;  %s538_s6 = inlined_call_operand.hbm [shape: f32[8,128], index: 6, kind: output, shape index: {}]  }
   0x1   :  { %s12_s23 = sshll.u32 %s532_s0, 4  ;;  %s13_s23 = int_to_ptr.hbm [resolvable:$true] %s12_s23 }
   0x2   :  { %15 = dma.hbm_to_smem %s13_s23, 16, %s457_s24, [#allocation2] }
   0x3   :  { %449 = dma.done.wait [#allocation2], 16 }
   0x4   :  { %450 = vsyncadd [#allocation2], 4294967280 }
   0x5   :  { %18 = sfence }
   0x6   :  { %19 = vsyncpa [#allocation5], 0 }
   0x7   :  { %20 = vsyncpa [#allocation8], 0  ;;  %s40_s27 = sshll.u32 %s534_s2, 4  ;;  %s41_s27 = int_to_ptr.hbm [resolvable:$true] %s40_s27 }
   0x8   :  { %21 = vsyncpa [#allocation6], 0  ;;  %s458_s28 = smov [#allocation7]   ;;  %s26_s0 = sshll.u32 %s533_s1, 4  ;;  %s27_s0 = int_to_ptr.hbm [resolvable:$true] %s26_s0 }
   0x9   :  { %s42_s29 = sshll.u32 %s458_s28, 4  ;;  %s459_s8 = smov [#allocation4]   ;;  %s43_s29 = int_to_ptr.vmem [resolvable:$true] %s42_s29 }
   0xa   :  { %45 = dma.hbm_to_vmem [thread:$0]  %s41_s27, 48, %s43_s29, [#allocation8]  }
   0xb   :  { %s28_s9 = sshll.u32 %s459_s8, 4  ;;  %s460_s10 = smov 384   ;;  %s29_s9 = int_to_ptr.vmem [resolvable:$true] %s28_s9 }
   0xc   :  { %s461_s11 = smov 24   ;;  %s52_s2 = sshll.u32 %s536_s4, 4  ;;  %s53_s2 = int_to_ptr.hbm [resolvable:$true] %s52_s2 }
   0xd   :  { %34 = dma.hbm_to_vmem [thread:$0]  %s27_s0, 768, %s29_s9, [#allocation5], %s460_s10, %s460_s10, %s461_s11  }
   0xe   :  { %s462_s14 = smov [#allocation9]   ;;  %s463_s16 = smov 128  }
   0xf   :  { %s54_s15 = sshll.u32 %s462_s14, 4  ;;  %s464_s17 = smov 8   ;;  %s55_s15 = int_to_ptr.vmem [resolvable:$true] %s54_s15 }
  0x10   :  { %60 = dma.hbm_to_vmem [thread:$0]  %s53_s2, 2048, %s55_s15, [#allocation8], %s463_s16, %s463_s16, %s464_s17  }
  0x11   :  { %451 = dma.done.wait [#allocation5], 768  }
  0x12   :  { %452 = vsyncadd [#allocation5], 4294966528 }
  0x13   :  { %453 = dma.done.wait [#allocation8], 2096  }
  0x14   :  { %454 = vsyncadd [#allocation8], 4294965200  ;;  %v75_v0 = vlaneseq  ;;  %s79_s1 = sld [smem:[#allocation3]]  ;;  %v125_v2 = vld [vmem:[#allocation4 + $0x18] sm:$0xff]  ;;  %v126_v3 = vld [vmem:[#allocation4 + $0x20] sm:$0xff]  ;;  %vm136_vm8 = vcmask 130048  }
  0x15   :  { %s306_s18 = sld [smem:[#allocation3 + $0x1]]  ;;  %v122_v4 = vld [vmem:[#allocation4] sm:$0xff]  ;;  %154 = vmatpush.msra.mxu0 %v125_v2  ;;  %174 = vmatpush.msra.mxu1 %v126_v3  ;;  %v123_v6 = vld [vmem:[#allocation4 + $0x8] sm:$0xff]  ;;  %v124_v10 = vld [vmem:[#allocation4 + $0x10] sm:$0xff]  ;;  %v465_v25 = vmov 0.0   ;;  %s466_s27 = smov [#allocation10]  }
  0x16   :  { %v76_v1 = vshrl.u32 %v75_v0, 7  ;;  %s307_s19 = sld [smem:[#allocation3 + $0x2]]  ;;  %v127_v9 = vld [vmem:[#allocation4 + $0x28] sm:$0xff]  ;;  %v118_v19 = vand.u32 127, %v75_v0  ;;  %v260_v29 = vld [vmem:[#allocation9 + $0x68] sm:$0xff]  ;;  %v259_v30 = vld [vmem:[#allocation9 + $0x60] sm:$0xff] }
  0x17   :  { %s308_s20 = sld [smem:[#allocation3 + $0x3]]  ;;  %194 = vmatpush.msra.mxu2 %v127_v9  ;;  %155 = vmatpush.msra.mxu0 %v122_v4  ;;  %v262_v27 = vld [vmem:[#allocation9 + $0x78] sm:$0xff]  ;;  %v261_v28 = vld [vmem:[#allocation9 + $0x70] sm:$0xff]  ;;  %v256_v33 = vld [vmem:[#allocation9 + $0x48] sm:$0xff]  ;;  %s293_s28 = sshll.u32 %s466_s27, 4  ;;  %s294_s28 = int_to_ptr.vmem [resolvable:$true] %s293_s28 }
  0x18   :  { %vm77_vm0 = vcmp.eq.s32.totalorder %v76_v1, 0  ;;  %s514_s21 = sld [smem:[#allocation3 + $0x4]]  ;;  %vm82_vm1 = vcmp.eq.s32.totalorder %v76_v1, 1  ;;  %vm87_vm2 = vcmp.eq.s32.totalorder %v76_v1, 2  ;;  %vm92_vm3 = vcmp.eq.s32.totalorder %v76_v1, 3  ;;  %175 = vmatpush.msra.mxu1 %v123_v6  ;;  %267 = vmatpush.msra.mxu3 %v262_v27  ;;  %v258_v31 = vld [vmem:[#allocation9 + $0x58] sm:$0xff] }
  0x19   :  { %s516_s4 = sld [smem:[#allocation3 + $0x5]]  ;;  %vm97_vm4 = vcmp.eq.s32.totalorder %v76_v1, 4  ;;  %vm102_vm5 = vcmp.eq.s32.totalorder %v76_v1, 5  ;;  %vm107_vm6 = vcmp.eq.s32.totalorder %v76_v1, 6  ;;  %195 = vmatpush.msra.mxu2 %v124_v10  ;;  %vm112_vm7 = vcmp.eq.s32.totalorder %v76_v1, 7  ;;  %v257_v32 = vld [vmem:[#allocation9 + $0x50] sm:$0xff] }
  0x1a   :  { %v80_v5 = vstv %s79_s1  ;;  %s311_s22 = sld [smem:[#allocation3 + $0x6]]  ;;  %268 = vmatpush.msra.mxu3 %v261_v28  ;;  %v255_v34 = vld [vmem:[#allocation9 + $0x40] sm:$0xff]  ;;  %v128_v35 = vld [vmem:[#allocation7] sm:$0x7]  ;;  %v253_v39 = vld [vmem:[#allocation9 + $0x30] sm:$0xff]  ;;  %s295_s7 = sshll.u32 %s538_s6, 4  ;;  %s296_s7 = int_to_ptr.hbm [resolvable:$true] %s295_s7 }
  0x1b   :  { %v81_v7 = vsel %vm77_vm0, %v80_v5, 0  ;;  %v85_v8 = vstv %s306_s18  ;;  %s312_s23 = sld [smem:[#allocation3 + $0x7]]  ;;  %v254_v36 = vld [vmem:[#allocation9 + $0x38] sm:$0xff]  ;;  %v130_v37 = vperm.slane %v128_v35, 0  ;;  %v131_v38 = vperm.slane %v128_v35, 1  ;;  %v252_v44 = vld [vmem:[#allocation9 + $0x28] sm:$0xff] }
  0x1c   :  { %v86_v11 = vsel %vm82_vm1, %v85_v8, %v81_v7  ;;  %v90_v12 = vstv %s307_s19  ;;  %269 = vmatpush.msra.mxu3 %v260_v29  ;;  %v251_v47 = vld [vmem:[#allocation9 + $0x20] sm:$0xff]  ;;  %v250_v48 = vld [vmem:[#allocation9 + $0x18] sm:$0xff]  ;;  %v249_v49 = vld [vmem:[#allocation9 + $0x10] sm:$0xff]  ;;  %v132_v63 = vperm.slane %v128_v35, 2 }
  0x1d   :  { %v91_v13 = vsel %vm87_vm2, %v90_v12, %v86_v11  ;;  %v95_v14 = vstv %s308_s20  ;;  %v248_v50 = vld [vmem:[#allocation9 + $0x8] sm:$0xff]  ;;  %v247_v51 = vld [vmem:[#allocation9] sm:$0xff] }
  0x1e   :  { %v96_v15 = vsel %vm92_vm3, %v95_v14, %v91_v13  ;;  %v100_v16 = vstv %s514_s21  ;;  %270 = vmatpush.msra.mxu3 %v259_v30  ;;  %v329_v5 = vld [vmem:[%s535_s3] ss:$0 sm:$0xff] }
  0x1f   :  { %v101_v17 = vsel %vm97_vm4, %v100_v16, %v96_v15  ;;  %v105_v18 = vstv %s516_s4 }
  0x20   :  { %v106_v20 = vsel %vm102_vm5, %v105_v18, %v101_v17  ;;  %v110_v21 = vstv %s311_s22  ;;  %271 = vmatpush.msra.mxu3 %v258_v31 }
  0x21   :  { %v111_v22 = vsel %vm107_vm6, %v110_v21, %v106_v20  ;;  %v115_v23 = vstv %s312_s23  ;;  %v330_v21 = vld [vmem:[%s537_s5] ss:$0 sm:$0xff] }
  0x22   :  { %v116_v24 = vsel %vm112_vm7, %v115_v23, %v111_v22  ;;  %272 = vmatpush.msra.mxu3 %v257_v32 }
  0x23   :  { %vm119_vm9 = vcmp.eq.s32.totalorder %v118_v19, %v116_v24 }
  0x24   :  { %v313_v26 = vsel %vm119_vm9, 1.0, %v465_v25  ;;  %273 = vmatpush.msra.mxu3 %v256_v33 }
  0x25   :  { %314 = vmatmul.msk.f32.vlgmr.msra.gmra.mxu0 %vm136_vm8, %v313_v26  ;;  %315 = vmatmul.msk.f32.vlgmr.msra.gmra.mxu1 %vm136_vm8, %v313_v26 }
  0x26   :  { %316 = vmatmul.msk.f32.vlgmr.msra.gmra.mxu2 %vm136_vm8, %v313_v26  ;;  %274 = vmatpush.msra.mxu3 %v255_v34 }
  0x28   :  { %275 = vmatpush.msra.mxu3 %v254_v36 }
  0x2a   :  { %276 = vmatpush.msra.mxu3 %v253_v39 }
  0x2c   :  { %277 = vmatpush.msra.mxu3 %v252_v44 }
  0x2e   :  { %278 = vmatpush.msra.mxu3 %v251_v47 }
  0x30   :  { %279 = vmatpush.msra.mxu3 %v250_v48 }
  0x32   :  { %280 = vmatpush.msra.mxu3 %v249_v49 }
  0x34   :  { %281 = vmatpush.msra.mxu3 %v248_v50 }
  0x36   :  { %282 = vmatpush.msra.mxu3 %v247_v51 }
  0xa2   :  { %v157_v40 = vpop.f32.mrf.mxu0  ;;  %v177_v41 = vpop.f32.mrf.mxu1 }
  0xa3   :  { %v158_v42 = vadd.f32 %v157_v40, %v130_v37  ;;  %v178_v43 = vadd.f32 %v177_v41, %v131_v38 }
  0xa5   :  { %v317_v45 = vmul.f32 -1.442695, %v158_v42  ;;  %v318_v46 = vmul.f32 -1.442695, %v178_v43 }
  0xa7   :  { %331 = vpow2.f32 %v317_v45 }
  0xa8   :  { %333 = vpow2.f32 %v318_v46 }
  0xa9   :  { %v197_v2 = vpop.f32.mrf.mxu2 }
  0xaa   :  { %v198_v7 = vadd.f32 %v197_v2, %v132_v63 }
  0xad   :  { %v332_v52 = vpop.eup %331 }
  0xae   :  { %v334_v53 = vpop.eup %333  ;;  %v203_v54 = vadd.f32 1.0, %v332_v52 }
  0xaf   :  { %v222_v55 = vadd.f32 1.0, %v334_v53 }
  0xb0   :  { %335 = vrcp.f32 %v203_v54  ;;  %v215_v61 = vand.u32 2147483648, %v203_v54  ;;  %v213_v1 = vand.u32 2147483647, %v203_v54  ;;  %vm209_vm11 = vweird.f32 %v203_v54 }
  0xb1   :  { %337 = vrcp.f32 %v222_v55  ;;  %vm228_vm14 = vweird.f32 %v222_v55  ;;  %v234_v12 = vand.u32 2147483648, %v222_v55  ;;  %v232_v13 = vand.u32 2147483647, %v222_v55 }
  0xb2   :  { %v216_v6 = vor.u32 1.1754944e-38, %v215_v61  ;;  %vm214_vm13 = vcmp.eq.f32.partialorder %v213_v1, 8.507059e+37 }
  0xb3   :  { %v235_v16 = vor.u32 1.1754944e-38, %v234_v12  ;;  %vm233_vm1 = vcmp.eq.f32.partialorder %v232_v13, 8.507059e+37 }
  0xb6   :  { %v336_v56 = vpop.eup %335 }
  0xb7   :  { %v338_v57 = vpop.eup %337  ;;  %v205_v58 = vmul.f32 %v336_v56, %v203_v54  ;;  %vm210_vm10 = vweird.f32 %v336_v56 }
  0xb8   :  { %v224_v59 = vmul.f32 %v338_v57, %v222_v55  ;;  %vm211_vm12 = vmor %vm209_vm11, %vm210_vm10  ;;  %vm229_vm15 = vweird.f32 %v338_v57 }
  0xb9   :  { %v206_v60 = vsub.f32 1.0, %v205_v58  ;;  %vm230_vm0 = vmor %vm228_vm14, %vm229_vm15 }
  0xba   :  { %v225_v62 = vsub.f32 1.0, %v224_v59 }
  0xbb   :  { %v207_v0 = vmul.f32 %v336_v56, %v206_v60 }
  0xbc   :  { %v226_v3 = vmul.f32 %v338_v57, %v225_v62 }
  0xbd   :  { %v208_v4 = vadd.f32 %v336_v56, %v207_v0 }
  0xbe   :  { %v227_v10 = vadd.f32 %v338_v57, %v226_v3 }
  0xbf   :  { %v212_v8 = vsel %vm211_vm12, %v336_v56, %v208_v4 }
  0xc0   :  { %v217_v9 = vsel %vm214_vm13, %v216_v6, %v212_v8  ;;  %v231_v15 = vsel %vm230_vm0, %v338_v57, %v227_v10 }
  0xc1   :  { %v242_v11 = vmul.f32 %v329_v5, %v217_v9  ;;  %v236_v17 = vsel %vm233_vm1, %v235_v16, %v231_v15 }
  0xc2   :  { %v245_v18 = vsub.f32 1.0, %v236_v17 }
  0xc3   :  { %v243_v14 = vadd.f32 %v242_v11, %v198_v7 }
  0xc5   :  { %339 = vtanh.f32 %v243_v14 }
  0xcb   :  { %v340_v19 = vpop.eup %339 }
  0xcc   :  { %v246_v20 = vmul.f32 %v340_v19, %v245_v18 }
  0xce   :  { %283 = vmatmul.f32.vlgmr.msra.gmra.mxu3 %v246_v20 }
 0x151   :  { %v284_v22 = vpop.f32.mrf.mxu3 }
 0x152   :  { %v285_v23 = vadd.f32 %v330_v21, %v284_v22 }
 0x154   :  { %287 = vst [vmem:[#allocation10] sm:$0xff] %v285_v23 }
 0x155   :  { %298 = dma.vmem_to_hbm [thread:$0]  %s294_s28, 128, %s296_s7, [#allocation6]  }
 0x156   :  { %455 = dma.done.wait [#allocation6], 128  }
 0x157   :  { %456 = vsyncadd [#allocation6], 4294967168 }
 0x158   :  { %303 = vsyncpa [#allocation5], 1 }
 0x159   :  { %304 = vsyncpa [#allocation8], 1 }
 0x15a   :  { %305 = vsyncpa [#allocation6], 1 }

</bundles_post_ra>
